<compile_context>
chip_gen: v6e
topology: v6e:2x2x1
jax: 0.10.0
libtpu: 0.0.40
codegen_flags: <defaults>
</compile_context>

<pallas_src>
import jax
import jax.numpy as jnp
from jax.experimental import pallas as pl
from jax.experimental.pallas import tpu as pltpu


def _prefix_encoder_kernel(tok_ref, w_ref, b_ref, out_ref):
    # tok_ref: (P, E), w_ref: (E, O), b_ref: (1, O), out_ref: (Bt, P, O)
    # Batch-invariant compute — executed once per batch *tile* (ceil(B/Bt)
    # times total, not once per batch element).
    # tanh in f32 (mandatory on v5e: no bf16 VPU/EUP), then cast to the weight
    # dtype so bf16 configs feed bf16 operands straight to the MXU.
    x = jnp.tanh(tok_ref[...].astype(jnp.float32)).astype(w_ref.dtype)
    y = jnp.dot(x, w_ref[...], preferred_element_type=jnp.float32)
    y = y + b_ref[...].astype(jnp.float32)           # (P, O) + (1, O) broadcast
    bt = out_ref.shape[0]
    # Leading-dim broadcast only: last two dims (P, O) unchanged, so no lane
    # relayout — the store is a sequence of full-lane writes.
    out_ref[...] = jnp.broadcast_to(y[None, :, :], (bt,) + y.shape).astype(
        out_ref.dtype)


def prefix_encoder_forward(prefix_tokens, weight, bias, batch_size,
                           *, max_block_bytes=4 * 1024 * 1024):
    """prefix_tokens: (P, E), weight: (E, O), bias: (O,). Returns (B, P, O)."""
    P, E = prefix_tokens.shape
    O = weight.shape[1]
    bias2d = bias.reshape(1, O)
    out_dtype = prefix_tokens.dtype

    # Pick a batch-tile size Bt so each output block is large (amortizes the
    # ~0.35 us per-step overhead) but stays well inside the scoped VMEM budget
    # on every chip (block is double-buffered; 4 MiB block -> 8 MiB, far under
    # v7x's 32 MiB scoped / 64 MiB physical VMEM).
    bytes_per_batch = P * O * jnp.dtype(out_dtype).itemsize
    bt = int(max(1, min(batch_size, max_block_bytes // max(1, bytes_per_batch))))
    grid = (pl.cdiv(batch_size, bt),)

    out = pl.pallas_call(
        _prefix_encoder_kernel,
        out_shape=jax.ShapeDtypeStruct((batch_size, P, O), out_dtype),
        grid_spec=pltpu.PrefetchScalarGridSpec(
            num_scalar_prefetch=0,
            grid=grid,
            in_specs=[
                pl.BlockSpec((P, E), lambda b: (0, 0)),
                pl.BlockSpec((E, O), lambda b: (0, 0)),
                pl.BlockSpec((1, O), lambda b: (0, 0)),
            ],
            out_specs=pl.BlockSpec((bt, P, O), lambda b: (b, 0, 0)),
        ),
        compiler_params=pltpu.CompilerParams(
            # No cross-step state -> safe to shard batch tiles across both
            # TensorCores on v7x for the store-bound writeback.
            dimension_semantics=("parallel",),
            # Explicit, conservative limit with headroom (valid on v5e/v6e/v7x).
            vmem_limit_bytes=32 * 1024 * 1024,
        ),
    )(prefix_tokens, weight, bias2d)
    return out


if __name__ == "__main__":
    # Small shapes consistent with the module.
    num_prefix_tokens = 8
    embed_dim = 32
    num_layers = 2
    batch_size = 2
    out_dim = num_layers * 2 * embed_dim  # 128

    key = jax.random.PRNGKey(0)
    k_tok, k_w, k_b = jax.random.split(key, 3)

    # Deterministic parameter init (the PyTorch default zeros for
    # prefix_tokens would make the test trivial, so use small random values —
    # still fully deterministic).
    prefix_tokens = 0.1 * jax.random.normal(
        k_tok, (num_prefix_tokens, embed_dim), dtype=jnp.float32)
    weight = 0.05 * jax.random.normal(
        k_w, (embed_dim, out_dim), dtype=jnp.float32)
    bias = 0.01 * jax.random.normal(k_b, (out_dim,), dtype=jnp.float32)

    out = prefix_encoder_forward(prefix_tokens, weight, bias, batch_size)
    out = jax.block_until_ready(out)

    # Pure-JAX reference for correctness check.
    ref = jnp.tanh(
        jnp.broadcast_to(prefix_tokens[None],
                         (batch_size, num_prefix_tokens, embed_dim)))
    ref = jnp.einsum("bpe,eo->bpo", ref, weight) + bias

    assert out.shape == (batch_size, num_prefix_tokens, out_dim), out.shape
    assert jnp.allclose(out, ref, atol=1e-5, rtol=1e-5), "mismatch vs reference"

    print("KERNEL_OK")
</pallas_src>

<mosaic_0001>
module attributes {stable_mosaic.version = 11 : i64} {
  func.func @_prefix_encoder_kernel(%arg0: i32, %arg1: memref<8x32xf32, #tpu.memory_space<vmem>>, %arg2: memref<32x128xf32, #tpu.memory_space<vmem>>, %arg3: memref<1x128xf32, #tpu.memory_space<vmem>>, %arg4: memref<2x8x128xf32, #tpu.memory_space<vmem>>) attributes {dimension_semantics = [#tpu.dimension_semantics<parallel>], iteration_bounds = array<i64: 1>, scalar_prefetch = 0 : i64, scratch_operands = 0 : i64, tpu.core_type = #tpu.core_type<tc>, window_params = [{pipeline_mode = #tpu.pipeline_mode<synchronous>, transform_indices = @transform_0, window_bounds = array<i64: 8, 32>}, {pipeline_mode = #tpu.pipeline_mode<synchronous>, transform_indices = @transform_1, window_bounds = array<i64: 32, 128>}, {pipeline_mode = #tpu.pipeline_mode<synchronous>, transform_indices = @transform_2, window_bounds = array<i64: 1, 128>}, {transform_indices = @transform_3, window_bounds = array<i64: 2, 8, 128>}]} {
    %c0 = arith.constant 0 : index
    %c0_0 = arith.constant 0 : index
    %0 = vector.load %arg1[%c0, %c0_0] : memref<8x32xf32, #tpu.memory_space<vmem>>, vector<8x32xf32>
    %1 = math.tanh %0 : vector<8x32xf32>
    %c0_1 = arith.constant 0 : index
    %c0_2 = arith.constant 0 : index
    %2 = vector.load %arg2[%c0_1, %c0_2] : memref<32x128xf32, #tpu.memory_space<vmem>>, vector<32x128xf32>
    %cst = arith.constant dense<0.000000e+00> : vector<8x128xf32>
    %3 = tpu.matmul %1, %2, %cst {dimension_numbers = #tpu.dot_dimension_numbers<[1], [0], [0], [1], [0, 0, 1, 1], [], []>} : vector<8x32xf32>, vector<32x128xf32>, vector<8x128xf32> -> vector<8x128xf32>
    %c0_3 = arith.constant 0 : index
    %c0_4 = arith.constant 0 : index
    %4 = vector.load %arg3[%c0_3, %c0_4] : memref<1x128xf32, #tpu.memory_space<vmem>>, vector<1x128xf32>
    %5 = vector.broadcast %4 : vector<1x128xf32> to vector<8x128xf32>
    %6 = arith.addf %3, %5 : vector<8x128xf32>
    %7 = vector.shape_cast %6 : vector<8x128xf32> to vector<1x8x128xf32>
    %8 = vector.shape_cast %7 : vector<1x8x128xf32> to vector<1x8x128xf32>
    %9 = vector.broadcast %8 : vector<1x8x128xf32> to vector<2x8x128xf32>
    %c0_5 = arith.constant 0 : index
    %c0_6 = arith.constant 0 : index
    %c0_7 = arith.constant 0 : index
    %10 = vector.load %arg4[%c0_5, %c0_6, %c0_7] : memref<2x8x128xf32, #tpu.memory_space<vmem>>, vector<2x8x128xf32>
    tpu.vector_store %arg4[%c0_5, %c0_6, %c0_7], %9 {strides = array<i32>} : memref<2x8x128xf32, #tpu.memory_space<vmem>>, vector<2x8x128xf32>,
    return
  }
  func.func @transform_0(%arg0: i32) -> (i32, i32) {
    %c0_i32 = arith.constant 0 : i32
    %c0_i32_0 = arith.constant 0 : i32
    %c0_i32_1 = arith.constant 0 : i32
    return %c0_i32, %c0_i32_0 : i32, i32
  }
  func.func @transform_1(%arg0: i32) -> (i32, i32) {
    %c0_i32 = arith.constant 0 : i32
    %c0_i32_0 = arith.constant 0 : i32
    %c0_i32_1 = arith.constant 0 : i32
    return %c0_i32, %c0_i32_0 : i32, i32
  }
  func.func @transform_2(%arg0: i32) -> (i32, i32) {
    %c0_i32 = arith.constant 0 : i32
    %c0_i32_0 = arith.constant 0 : i32
    %c0_i32_1 = arith.constant 0 : i32
    return %c0_i32, %c0_i32_0 : i32, i32
  }
  func.func @transform_3(%arg0: i32) -> (i32, i32, i32) {
    %c0_i32 = arith.constant 0 : i32
    %c0_i32_0 = arith.constant 0 : i32
    %c0_i32_1 = arith.constant 0 : i32
    return %arg0, %c0_i32, %c0_i32_0 : i32, i32, i32
  }
}

</mosaic_0001>

<bundles_post_ra>
// kernel: tpu_custom_call.1
= control target key start
LH: loop header
LB: loop body
LE: loop exit
PB: predicated region body
PF: predicated region fallthrough
CT: control target
= control target key end

     0   :  { %8 = vsyncpa [#allocation3], 0  ;;  %s286_s0 = inlined_call_operand.hbm [shape: f32[8,32], index: 0, kind: input, shape index: {}]   ;;  %s287_s1 = inlined_call_operand.hbm [shape: f32[32,128], index: 1, kind: input, shape index: {}]   ;;  %s288_s2 = inlined_call_operand.vmem [shape: f32[1,128], index: 2, kind: input, shape index: {}]   ;;  %s289_s3 = inlined_call_operand.hbm [shape: f32[2,8,128], index: 3, kind: output, shape index: {}]  }
   0x1   :  { %9 = vsyncpa [#allocation6], 0 }
   0x2   :  { %10 = vsyncpa [#allocation4], 0  ;;  %s241_s12 = smov [#allocation2]   ;;  %s242_s14 = smov [#allocation5]  }
   0x3   :  { %s17_s13 = sshll.u32 %s241_s12, 4  ;;  %s26_s15 = sshll.u32 %s242_s14, 4  ;;  %s18_s13 = int_to_ptr.vmem [resolvable:$true] %s17_s13  ;;  %s27_s15 = int_to_ptr.vmem [resolvable:$true] %s26_s15 }
   0x4   :  { %s183_s16 = scalar_lea.vmem %s18_s13, 128  ;;  %p188_p1 = scmp.lt.s32.totalorder %s18_s13, %s18_s13 }
   0x5   :  { %p184_p0 = scmp.ne.s32.totalorder %s18_s13, %s183_s16  ;;  %p189_p2 = scmp.lt.s32.totalorder %s183_s16, %s183_s16 }
   0x7   :  { %p190_p3 = por %p189_p2, %p188_p1 }
   0x9   :  { %p191_p4 = pnand %p190_p3, %p184_p0 }
   0xb   :  { %194 = shalt.err (!%p191_p4)
}
   0xc   :  { %20 = dma.hbm_to_vmem [thread:$0]  %s286_s0, 128, %s18_s13, [#allocation3]  }
   0xd   :  { %s203_s19 = scalar_lea.vmem %s27_s15, 512  ;;  %p208_p6 = scmp.lt.s32.totalorder %s27_s15, %s27_s15 }
   0xe   :  { %p204_p5 = scmp.ne.s32.totalorder %s27_s15, %s203_s19  ;;  %p209_p7 = scmp.lt.s32.totalorder %s203_s19, %s203_s19 }
  0x10   :  { %p210_p8 = por %p209_p7, %p208_p6 }
  0x12   :  { %p211_p9 = pnand %p210_p8, %p204_p5 }
  0x14   :  { %214 = shalt.err (!%p211_p9)
}
  0x15   :  { %s243_s20 = smov 128   ;;  %s244_s21 = smov 8  }
  0x16   :  { %32 = dma.hbm_to_vmem [thread:$0]  %s287_s1, 512, %s27_s15, [#allocation6], %s243_s20, %s243_s20, %s244_s21  }
  0x17   :  { %235 = dma.done.wait [#allocation3], 128  }
  0x18   :  { %236 = vsyncadd [#allocation3], 4294967168 }
  0x19   :  { %237 = dma.done.wait [#allocation6], 512  }
  0x1a   :  { %238 = vsyncadd [#allocation6], 4294966784  ;;  %v245_v0 = vmov 0.0   ;;  %vm246_vm0 = vmmov 0   ;;  %v46_v1 = vld [vmem:[#allocation5 + $0x18] sm:$0xff]  ;;  %v45_v2 = vld [vmem:[#allocation5 + $0x10] sm:$0xff] }
  0x1b   :  { %155 = vmatprep.subr.mxu0 %v245_v0  ;;  %163 = vmatprep.mubr.msk.f32.mxu0 %vm246_vm0, %v245_v0  ;;  %v41_v3 = vld [vmem:[#allocation2] sm:$0xff]  ;;  %v44_v4 = vld [vmem:[#allocation5 + $0x8] sm:$0xff]  ;;  %v43_v5 = vld [vmem:[#allocation5] sm:$0xff]  ;;  %vm54_vm1 = vcmask 261120   ;;  %s247_s24 = smov [#allocation7]  }
  0x1c   :  { %156 = vmatpush3.msra.mxu0 %v46_v1  ;;  %173 = vtanh.f32 %v41_v3  ;;  %v148_v7 = vld [vmem:[%s288_s2] ss:$0 sm:$0xff]  ;;  %s135_s25 = sshll.u32 %s247_s24, 4  ;;  %s136_s25 = int_to_ptr.vmem [resolvable:$true] %s135_s25 }
  0x1d   :  { %157 = vmatprep.subr.mxu0 %v245_v0  ;;  %s215_s26 = scalar_lea.vmem %s136_s25, 256  ;;  %p220_p11 = scmp.lt.s32.totalorder %s136_s25, %s136_s25 }
  0x1e   :  { %158 = vmatpush3.msra.mxu0 %v45_v2  ;;  %p216_p10 = scmp.ne.s32.totalorder %s136_s25, %s215_s26  ;;  %p221_p12 = scmp.lt.s32.totalorder %s215_s26, %s215_s26 }
  0x1f   :  { %159 = vmatprep.subr.mxu0 %v245_v0 }
  0x20   :  { %160 = vmatpush3.msra.mxu0 %v44_v4  ;;  %p222_p13 = por %p221_p12, %p220_p11 }
  0x21   :  { %161 = vmatprep.subr.mxu0 %v245_v0 }
  0x22   :  { %162 = vmatpush3.msra.mxu0 %v43_v5  ;;  %p223_p0 = pnand %p222_p13, %p216_p10 }
  0x29   :  { %v174_v6 = vpop.eup %173 }
  0x2a   :  { %164 = vmatmul.mubr.msk.f32.vlgmr.msra.gmra.mxu0 %vm54_vm1, %v174_v6 }
  0xea   :  { %v124_v8 = vpop.f32.mrf.mxu0 }
  0xeb   :  { %v125_v9 = vadd.f32 %v148_v7, %v124_v8 }
  0xec   :  { %v165_v10 = vpop.f32.mrf.mxu0 }
  0xed   :  { %128 = vst [vmem:[#allocation7] sm:$0xff] %v125_v9  ;;  %129 = vst [vmem:[#allocation7 + $0x8] sm:$0xff] %v125_v9 }
  0xee   :  { %226 = shalt.err (!%p223_p0)
}
  0xef   :  { %141 = dma.vmem_to_hbm [thread:$0]  %s136_s25, 256, %s289_s3, [#allocation4], %s243_s20, %s243_s20, %s244_s21  }
  0xf0   :  { %239 = dma.done.wait [#allocation4], 256  }
  0xf1   :  { %240 = vsyncadd [#allocation4], 4294967040 }
  0xf2   :  { %145 = vsyncpa [#allocation3], 1 }
  0xf3   :  { %146 = vsyncpa [#allocation6], 1 }
  0xf4   :  { %147 = vsyncpa [#allocation4], 1 }

</bundles_post_ra>
